<compile_context>
chip_gen: v6e
topology: v6e:2x2x1
jax: 0.10.0
libtpu: 0.0.40
codegen_flags: <defaults>
</compile_context>

<pallas_src>
import math

import jax
import jax.numpy as jnp
import numpy as np
from jax.experimental import pallas as pl
from jax.experimental.pallas import tpu as pltpu

BN_EPS = 1e-5
LANES = 128


def _align8(n):
    return (n + 7) // 8 * 8


def _align_lanes(n):
    return (n + LANES - 1) // LANES * LANES


def _bn_relu(a, gamma, beta):
    """BatchNorm1d (training mode, biased variance) fused with ReLU.

    Single scale/shift per element: relu(a * scale + shift) with
    scale = gamma * rsqrt(var + eps), shift = beta - mu * scale.
    """
    mu = jnp.mean(a, axis=0, keepdims=True)
    var = jnp.mean((a - mu) ** 2, axis=0, keepdims=True)
    scale = gamma * jax.lax.rsqrt(var + BN_EPS)
    shift = beta - mu * scale
    return jnp.maximum(a * scale + shift, 0.0)


def _weight_layout(X_dim, y_dim, h_dim, Z_dim):
    """Shapes and 8-aligned row offsets of each block in the weight slab."""
    shapes = [
        (X_dim + y_dim, h_dim + Z_dim),  # w1_ext = [w1 | [0; w6y]]
        (h_dim, 2 * Z_dim),              # w24 = [w2 | w4]
        (2 * Z_dim, 2 * Z_dim),          # w35 = blockdiag(w3, w5)
        (Z_dim, Z_dim),                  # w6z
        (Z_dim, h_dim),                  # w7
        (h_dim, X_dim),                  # w8
    ]
    offsets = []
    off = 0
    for r, _ in shapes:
        offsets.append(off)
        off += _align8(r)
    nrows = _align8(off)
    ncols = _align_lanes(max(c for _, c in shapes))
    return shapes, offsets, nrows, ncols


def pack_params(params, X_dim, y_dim, h_dim, Z_dim):
    """One-time (off the per-call path) packing of all parameters into two
    lane-dense slabs: a weight slab and a per-feature-vector slab."""
    (w1, b1, g1, be1,
     w2, b2, g2, be2, w3, b3,
     w4, b4, g4, be4, w5, b5,
     w6, b6, g6, be6, w7, b7, g7, be7,
     w8, b8) = [np.asarray(p, np.float32) for p in params]

    # Fused / folded weights.
    w24 = np.concatenate([w2, w4], axis=1)                       # (h, 2Z)
    zpad = np.zeros((Z_dim, Z_dim), np.float32)
    w35 = np.block([[w3, zpad], [zpad, w5]])                     # (2Z, 2Z)
    w6z, w6y = w6[:Z_dim], w6[Z_dim:]
    # First matmul computes both x2h pre-activation and y@w6y in one push.
    w1e = np.concatenate(
        [w1, np.concatenate([np.zeros((X_dim, Z_dim), np.float32), w6y], axis=0)],
        axis=1)                                                  # (X+y, h+Z)

    b1e = np.concatenate([b1, b6], axis=1)                       # [b1 | b6]
    b24 = np.concatenate([b2, b4], axis=1)
    g24 = np.concatenate([g2, g4], axis=1)
    be24 = np.concatenate([be2, be4], axis=1)
    b35 = np.concatenate([b3, b5], axis=1)

    weights = [w1e, w24, w35, w6z, w7, w8]
    vecs = [b1e, g1, be1, b24, g24, be24, b35, g6, be6, b7, g7, be7, b8]

    _, offsets, nrows, ncols = _weight_layout(X_dim, y_dim, h_dim, Z_dim)
    w_slab = np.zeros((nrows, ncols), np.float32)
    for off, w in zip(offsets, weights):
        r, c = w.shape
        w_slab[off:off + r, :c] = w

    v_slab = np.zeros((_align8(len(vecs)), ncols), np.float32)
    for i, v in enumerate(vecs):
        v_slab[i, :v.shape[1]] = v[0]

    return jnp.asarray(w_slab), jnp.asarray(v_slab)


def _make_vae_kernel(X_dim, y_dim, h_dim, Z_dim, out_cols):
    _, offs, _, _ = _weight_layout(X_dim, y_dim, h_dim, Z_dim)
    o1, o24, o35, o6z, o7, o8 = offs
    HZ = h_dim + Z_dim
    Z2 = 2 * Z_dim

    def vae_kernel(xy_ref, eps_ref, w_ref, v_ref, out_ref):
        xy = xy_ref[...]
        eps = eps_ref[...]

        # ---- Static slices of the packed weight slab (8-aligned rows). ----
        w1e = w_ref[o1:o1 + X_dim + y_dim, 0:HZ]
        w24 = w_ref[o24:o24 + h_dim, 0:Z2]
        w35 = w_ref[o35:o35 + Z2, 0:Z2]
        w6z = w_ref[o6z:o6z + Z_dim, 0:Z_dim]
        w7 = w_ref[o7:o7 + Z_dim, 0:h_dim]
        w8 = w_ref[o8:o8 + h_dim, 0:X_dim]

        # ---- Per-feature vectors from one slab (static slices). ----
        b1e = v_ref[0:1, 0:HZ]         # [b1 | b6]
        g1 = v_ref[1:2, 0:h_dim]
        be1 = v_ref[2:3, 0:h_dim]
        b24 = v_ref[3:4, 0:Z2]
        g24 = v_ref[4:5, 0:Z2]
        be24 = v_ref[5:6, 0:Z2]
        b35 = v_ref[6:7, 0:Z2]
        g6 = v_ref[7:8, 0:Z_dim]
        be6 = v_ref[8:9, 0:Z_dim]
        b7 = v_ref[9:10, 0:h_dim]
        g7 = v_ref[10:11, 0:h_dim]
        be7 = v_ref[11:12, 0:h_dim]
        b8 = v_ref[12:13, 0:X_dim]

        # ---- One MXU push: x2h pre-activation AND y@w6y (+b6). ----
        t0 = jnp.dot(xy, w1e, preferred_element_type=jnp.float32) + b1e
        h = _bn_relu(t0[:, :h_dim], g1, be1)
        yb6 = t0[:, h_dim:]            # = y @ w6y + b6

        # ---- Q: fused h2mu / h2var (lane-concat, then block-diagonal). ----
        t = _bn_relu(jnp.dot(h, w24, preferred_element_type=jnp.float32) + b24,
                     g24, be24)
        zmv = jnp.dot(t, w35, preferred_element_type=jnp.float32) + b35
        z_mu = zmv[:, :Z_dim]
        z_var = zmv[:, Z_dim:]

        # ---- sample_z: mu + exp(log_var / 2) * eps ----
        z = z_mu + jnp.exp(z_var * 0.5) * eps

        # ---- P: z2h (first Linear's y-term came from t0) ----
        u = _bn_relu(jnp.dot(z, w6z, preferred_element_type=jnp.float32) + yb6,
                     g6, be6)
        h_hat = _bn_relu(jnp.dot(u, w7, preferred_element_type=jnp.float32) + b7,
                         g7, be7)

        # ---- h2x: Linear -> Tanh ----
        x_rec = jnp.tanh(
            jnp.dot(h_hat, w8, preferred_element_type=jnp.float32) + b8)

        # ---- Single lane-dense 128-wide output slab: one unmasked store. ----
        parts = [x_rec, z, zmv]
        pad = out_cols - (X_dim + 3 * Z_dim)
        if pad > 0:
            parts.append(jnp.zeros((xy.shape[0], pad), jnp.float32))
        out_ref[...] = jnp.concatenate(parts, axis=1)

    return vae_kernel


def vae_forward(X, y, eps, w_slab, v_slab, h_dim):
    """Full CVAE forward pass in one Pallas kernel.

    Returns (x_reconstruction, z, z_mu, z_var), mirroring Model.forward.
    """
    batch, X_dim = X.shape
    y_dim = y.shape[1]
    Z_dim = eps.shape[1]
    out_cols = _align_lanes(X_dim + 3 * Z_dim)

    # Only per-call wrapper work: torch.cat([X, y], 1).
    Xy = jnp.concatenate([X, y], axis=1)

    kernel = _make_vae_kernel(X_dim, y_dim, h_dim, Z_dim, out_cols)
    vmem = pl.BlockSpec(memory_space=pltpu.MemorySpace.VMEM)
    args = (Xy, eps, w_slab, v_slab)

    # Advisory cost estimate for the XLA scheduler.
    in_bytes = sum(int(np.prod(a.shape)) * a.dtype.itemsize for a in args)
    out_bytes = batch * out_cols * 4
    flops = 2 * batch * ((X_dim + y_dim) * (h_dim + Z_dim)   # x2h + y@w6y fold
                         + h_dim * 2 * Z_dim                 # fused h2mu/h2var s1
                         + 2 * Z_dim * 2 * Z_dim             # fused s2 (block-diag)
                         + Z_dim * Z_dim                     # z @ w6z
                         + Z_dim * h_dim                     # z2h second Linear
                         + h_dim * X_dim)                    # h2x
    transcendentals = batch * (Z_dim + X_dim) + 2 * h_dim + 3 * Z_dim

    out = pl.pallas_call(
        kernel,
        out_shape=jax.ShapeDtypeStruct((batch, out_cols), jnp.float32),
        in_specs=[vmem] * len(args),
        out_specs=vmem,
        cost_estimate=pl.CostEstimate(flops=flops,
                                      transcendentals=transcendentals,
                                      bytes_accessed=in_bytes + out_bytes),
    )(*args)

    x_rec = out[:, :X_dim]
    z = out[:, X_dim:X_dim + Z_dim]
    z_mu = out[:, X_dim + Z_dim:X_dim + 2 * Z_dim]
    z_var = out[:, X_dim + 2 * Z_dim:X_dim + 3 * Z_dim]
    return x_rec, z, z_mu, z_var


def init_params(key, X_dim, y_dim, h_dim, Z_dim):
    """Deterministic parameter init matching the PyTorch module's shapes.

    Linear layers use PyTorch's default U(-1/sqrt(fan_in), 1/sqrt(fan_in));
    BatchNorm uses gamma=1, beta=0.  Weights are stored as (in, out).
    """
    keys = iter(jax.random.split(key, 10))

    def lin(fan_in, fan_out):
        k = next(keys)
        bound = 1.0 / math.sqrt(fan_in)
        kw, kb = jax.random.split(k)
        w = jax.random.uniform(kw, (fan_in, fan_out), jnp.float32, -bound, bound)
        b = jax.random.uniform(kb, (1, fan_out), jnp.float32, -bound, bound)
        return w, b

    def bn(dim):
        return jnp.ones((1, dim), jnp.float32), jnp.zeros((1, dim), jnp.float32)

    w1, b1 = lin(X_dim + y_dim, h_dim); g1, be1 = bn(h_dim)   # x2h
    w2, b2 = lin(h_dim, Z_dim);         g2, be2 = bn(Z_dim)   # h2mu (Linear, BN)
    w3, b3 = lin(Z_dim, Z_dim)                                 # h2mu (last Linear)
    w4, b4 = lin(h_dim, Z_dim);         g4, be4 = bn(Z_dim)   # h2var (Linear, BN)
    w5, b5 = lin(Z_dim, Z_dim)                                 # h2var (last Linear)
    w6, b6 = lin(Z_dim + y_dim, Z_dim); g6, be6 = bn(Z_dim)   # z2h (first Linear, BN)
    w7, b7 = lin(Z_dim, h_dim);         g7, be7 = bn(h_dim)   # z2h (second Linear, BN)
    w8, b8 = lin(h_dim, X_dim)                                 # h2x

    return [w1, b1, g1, be1,
            w2, b2, g2, be2, w3, b3,
            w4, b4, g4, be4, w5, b5,
            w6, b6, g6, be6, w7, b7, g7, be7,
            w8, b8]


def _reference_forward(X, y, eps, params):
    """Plain-JAX transcription of Model.forward (unfused), for verification."""
    (w1, b1, g1, be1,
     w2, b2, g2, be2, w3, b3,
     w4, b4, g4, be4, w5, b5,
     w6, b6, g6, be6, w7, b7, g7, be7,
     w8, b8) = params

    def bn(a, g, b):
        mu = jnp.mean(a, axis=0, keepdims=True)
        var = jnp.mean((a - mu) ** 2, axis=0, keepdims=True)
        return (a - mu) / jnp.sqrt(var + BN_EPS) * g + b

    relu = lambda a: jnp.maximum(a, 0.0)

    h = relu(bn(jnp.concatenate([X, y], 1) @ w1 + b1, g1, be1))
    z_mu = relu(bn(h @ w2 + b2, g2, be2)) @ w3 + b3
    z_var = relu(bn(h @ w4 + b4, g4, be4)) @ w5 + b5
    z = z_mu + jnp.exp(z_var / 2.0) * eps
    u = relu(bn(jnp.concatenate([z, y], 1) @ w6 + b6, g6, be6))
    h_hat = relu(bn(u @ w7 + b7, g7, be7))
    x = jnp.tanh(h_hat @ w8 + b8)
    return x, z, z_mu, z_var


if __name__ == "__main__":
    # Small shapes consistent with the module's constructor args.
    batch, X_dim, y_dim, h_dim, Z_dim = 8, 16, 4, 32, 8

    key = jax.random.PRNGKey(0)
    kx, ky, keps, kp = jax.random.split(key, 4)
    X = jax.random.normal(kx, (batch, X_dim), jnp.float32)
    y = jax.random.normal(ky, (batch, y_dim), jnp.float32)
    # eps reproduces torch.randn(batch_size, Z_dim) in sample_z; drawn host-side
    # so the kernel stays deterministic given the key.
    eps = jax.random.normal(keps, (batch, Z_dim), jnp.float32)

    params = init_params(kp, X_dim, y_dim, h_dim, Z_dim)

    # One-time parameter packing (off the per-call path).
    w_slab, v_slab = pack_params(params, X_dim, y_dim, h_dim, Z_dim)
    jax.block_until_ready((w_slab, v_slab))

    x_rec, z, z_mu, z_var = vae_forward(X, y, eps, w_slab, v_slab, h_dim)
    jax.block_until_ready((x_rec, z, z_mu, z_var))

    assert x_rec.shape == (batch, X_dim)
    assert z.shape == (batch, Z_dim)
    assert z_mu.shape == (batch, Z_dim)
    assert z_var.shape == (batch, Z_dim)

    # Verify the fused/packed kernel against the direct (unfused) transcription.
    rx, rz, rmu, rvar = _reference_forward(X, y, eps, params)
    for got, ref in ((x_rec, rx), (z, rz), (z_mu, rmu), (z_var, rvar)):
        np.testing.assert_allclose(np.asarray(got), np.asarray(ref),
                                   rtol=1e-3, atol=1e-3)

    print("KERNEL_OK")
</pallas_src>

<mosaic_0001>
module attributes {stable_mosaic.version = 11 : i64} {
  func.func @vae_kernel(%arg0: memref<8x20xf32, #tpu.memory_space<vmem>>, %arg1: memref<8x8xf32, #tpu.memory_space<vmem>>, %arg2: memref<120x128xf32, #tpu.memory_space<vmem>>, %arg3: memref<16x128xf32, #tpu.memory_space<vmem>>, %arg4: memref<8x128xf32, #tpu.memory_space<vmem>>) attributes {dimension_semantics = [], scalar_prefetch = 0 : i64, scratch_operands = 0 : i64, tpu.core_type = #tpu.core_type<tc>} {
    %c0 = arith.constant 0 : index
    %c0_0 = arith.constant 0 : index
    %0 = vector.load %arg0[%c0, %c0_0] : memref<8x20xf32, #tpu.memory_space<vmem>>, vector<8x20xf32>
    %c0_1 = arith.constant 0 : index
    %c0_2 = arith.constant 0 : index
    %1 = vector.load %arg1[%c0_1, %c0_2] : memref<8x8xf32, #tpu.memory_space<vmem>>, vector<8x8xf32>
    %c0_3 = arith.constant 0 : index
    %c0_4 = arith.constant 0 : index
    %2 = vector.load %arg2[%c0_3, %c0_4] : memref<120x128xf32, #tpu.memory_space<vmem>>, vector<20x40xf32>
    %c24 = arith.constant 24 : index
    %c0_5 = arith.constant 0 : index
    %3 = vector.load %arg2[%c24, %c0_5] : memref<120x128xf32, #tpu.memory_space<vmem>>, vector<32x16xf32>
    %c56 = arith.constant 56 : index
    %c0_6 = arith.constant 0 : index
    %4 = vector.load %arg2[%c56, %c0_6] : memref<120x128xf32, #tpu.memory_space<vmem>>, vector<16x16xf32>
    %c72 = arith.constant 72 : index
    %c0_7 = arith.constant 0 : index
    %5 = vector.load %arg2[%c72, %c0_7] : memref<120x128xf32, #tpu.memory_space<vmem>>, vector<8x8xf32>
    %c80 = arith.constant 80 : index
    %c0_8 = arith.constant 0 : index
    %6 = vector.load %arg2[%c80, %c0_8] : memref<120x128xf32, #tpu.memory_space<vmem>>, vector<8x32xf32>
    %c88 = arith.constant 88 : index
    %c0_9 = arith.constant 0 : index
    %7 = vector.load %arg2[%c88, %c0_9] : memref<120x128xf32, #tpu.memory_space<vmem>>, vector<32x16xf32>
    %c0_10 = arith.constant 0 : index
    %c0_11 = arith.constant 0 : index
    %8 = vector.load %arg3[%c0_10, %c0_11] : memref<16x128xf32, #tpu.memory_space<vmem>>, vector<1x40xf32>
    %c1 = arith.constant 1 : index
    %c0_12 = arith.constant 0 : index
    %9 = vector.load %arg3[%c1, %c0_12] : memref<16x128xf32, #tpu.memory_space<vmem>>, vector<1x32xf32>
    %c2 = arith.constant 2 : index
    %c0_13 = arith.constant 0 : index
    %10 = vector.load %arg3[%c2, %c0_13] : memref<16x128xf32, #tpu.memory_space<vmem>>, vector<1x32xf32>
    %c3 = arith.constant 3 : index
    %c0_14 = arith.constant 0 : index
    %11 = vector.load %arg3[%c3, %c0_14] : memref<16x128xf32, #tpu.memory_space<vmem>>, vector<1x16xf32>
    %c4 = arith.constant 4 : index
    %c0_15 = arith.constant 0 : index
    %12 = vector.load %arg3[%c4, %c0_15] : memref<16x128xf32, #tpu.memory_space<vmem>>, vector<1x16xf32>
    %c5 = arith.constant 5 : index
    %c0_16 = arith.constant 0 : index
    %13 = vector.load %arg3[%c5, %c0_16] : memref<16x128xf32, #tpu.memory_space<vmem>>, vector<1x16xf32>
    %c6 = arith.constant 6 : index
    %c0_17 = arith.constant 0 : index
    %14 = vector.load %arg3[%c6, %c0_17] : memref<16x128xf32, #tpu.memory_space<vmem>>, vector<1x16xf32>
    %c7 = arith.constant 7 : index
    %c0_18 = arith.constant 0 : index
    %15 = vector.load %arg3[%c7, %c0_18] : memref<16x128xf32, #tpu.memory_space<vmem>>, vector<1x8xf32>
    %c8 = arith.constant 8 : index
    %c0_19 = arith.constant 0 : index
    %16 = vector.load %arg3[%c8, %c0_19] : memref<16x128xf32, #tpu.memory_space<vmem>>, vector<1x8xf32>
    %c9 = arith.constant 9 : index
    %c0_20 = arith.constant 0 : index
    %17 = vector.load %arg3[%c9, %c0_20] : memref<16x128xf32, #tpu.memory_space<vmem>>, vector<1x32xf32>
    %c10 = arith.constant 10 : index
    %c0_21 = arith.constant 0 : index
    %18 = vector.load %arg3[%c10, %c0_21] : memref<16x128xf32, #tpu.memory_space<vmem>>, vector<1x32xf32>
    %c11 = arith.constant 11 : index
    %c0_22 = arith.constant 0 : index
    %19 = vector.load %arg3[%c11, %c0_22] : memref<16x128xf32, #tpu.memory_space<vmem>>, vector<1x32xf32>
    %c12 = arith.constant 12 : index
    %c0_23 = arith.constant 0 : index
    %20 = vector.load %arg3[%c12, %c0_23] : memref<16x128xf32, #tpu.memory_space<vmem>>, vector<1x16xf32>
    %cst = arith.constant dense<0.000000e+00> : vector<8x40xf32>
    %21 = tpu.matmul %0, %2, %cst {dimension_numbers = #tpu.dot_dimension_numbers<[1], [0], [0], [1], [0, 0, 1, 1], [], []>} : vector<8x20xf32>, vector<20x40xf32>, vector<8x40xf32> -> vector<8x40xf32>
    %22 = vector.broadcast %8 : vector<1x40xf32> to vector<8x40xf32>
    %23 = arith.addf %21, %22 : vector<8x40xf32>
    %24 = vector.extract_strided_slice %23 {offsets = [0, 0], sizes = [8, 32], strides = [1, 1]} : vector<8x40xf32> to vector<8x32xf32>
    %cst_24 = arith.constant dense<0.000000e+00> : vector<32xf32>
    %25 = vector.multi_reduction <add>, %24, %cst_24 [0] : vector<8x32xf32> to vector<32xf32>
    %26 = vector.shape_cast %25 : vector<32xf32> to vector<1x32xf32>
    %cst_25 = arith.constant 8.000000e+00 : f32
    %27 = vector.broadcast %cst_25 : f32 to vector<1x32xf32>
    %28 = arith.divf %26, %27 : vector<1x32xf32>
    %29 = vector.broadcast %28 : vector<1x32xf32> to vector<8x32xf32>
    %30 = arith.subf %24, %29 : vector<8x32xf32>
    %31 = arith.mulf %30, %30 : vector<8x32xf32>
    %cst_26 = arith.constant dense<0.000000e+00> : vector<32xf32>
    %32 = vector.multi_reduction <add>, %31, %cst_26 [0] : vector<8x32xf32> to vector<32xf32>
    %33 = vector.shape_cast %32 : vector<32xf32> to vector<1x32xf32>
    %cst_27 = arith.constant 8.000000e+00 : f32
    %34 = vector.broadcast %cst_27 : f32 to vector<1x32xf32>
    %35 = arith.divf %33, %34 : vector<1x32xf32>
    %cst_28 = arith.constant 9.99999974E-6 : f32
    %36 = vector.broadcast %cst_28 : f32 to vector<1x32xf32>
    %37 = arith.addf %35, %36 : vector<1x32xf32>
    %38 = math.rsqrt %37 : vector<1x32xf32>
    %39 = arith.mulf %9, %38 : vector<1x32xf32>
    %40 = arith.mulf %28, %39 : vector<1x32xf32>
    %41 = arith.subf %10, %40 : vector<1x32xf32>
    %42 = vector.broadcast %39 : vector<1x32xf32> to vector<8x32xf32>
    %43 = arith.mulf %24, %42 : vector<8x32xf32>
    %44 = vector.broadcast %41 : vector<1x32xf32> to vector<8x32xf32>
    %45 = arith.addf %43, %44 : vector<8x32xf32>
    %cst_29 = arith.constant 0.000000e+00 : f32
    %46 = vector.broadcast %cst_29 : f32 to vector<8x32xf32>
    %47 = arith.maximumf %45, %46 : vector<8x32xf32>
    %48 = vector.extract_strided_slice %23 {offsets = [0, 32], sizes = [8, 8], strides = [1, 1]} : vector<8x40xf32> to vector<8x8xf32>
    %cst_30 = arith.constant dense<0.000000e+00> : vector<8x16xf32>
    %49 = tpu.matmul %47, %3, %cst_30 {dimension_numbers = #tpu.dot_dimension_numbers<[1], [0], [0], [1], [0, 0, 1, 1], [], []>} : vector<8x32xf32>, vector<32x16xf32>, vector<8x16xf32> -> vector<8x16xf32>
    %50 = vector.broadcast %11 : vector<1x16xf32> to vector<8x16xf32>
    %51 = arith.addf %49, %50 : vector<8x16xf32>
    %cst_31 = arith.constant dense<0.000000e+00> : vector<16xf32>
    %52 = vector.multi_reduction <add>, %51, %cst_31 [0] : vector<8x16xf32> to vector<16xf32>
    %53 = vector.shape_cast %52 : vector<16xf32> to vector<1x16xf32>
    %cst_32 = arith.constant 8.000000e+00 : f32
    %54 = vector.broadcast %cst_32 : f32 to vector<1x16xf32>
    %55 = arith.divf %53, %54 : vector<1x16xf32>
    %56 = vector.broadcast %55 : vector<1x16xf32> to vector<8x16xf32>
    %57 = arith.subf %51, %56 : vector<8x16xf32>
    %58 = arith.mulf %57, %57 : vector<8x16xf32>
    %cst_33 = arith.constant dense<0.000000e+00> : vector<16xf32>
    %59 = vector.multi_reduction <add>, %58, %cst_33 [0] : vector<8x16xf32> to vector<16xf32>
    %60 = vector.shape_cast %59 : vector<16xf32> to vector<1x16xf32>
    %cst_34 = arith.constant 8.000000e+00 : f32
    %61 = vector.broadcast %cst_34 : f32 to vector<1x16xf32>
    %62 = arith.divf %60, %61 : vector<1x16xf32>
    %cst_35 = arith.constant 9.99999974E-6 : f32
    %63 = vector.broadcast %cst_35 : f32 to vector<1x16xf32>
    %64 = arith.addf %62, %63 : vector<1x16xf32>
    %65 = math.rsqrt %64 : vector<1x16xf32>
    %66 = arith.mulf %12, %65 : vector<1x16xf32>
    %67 = arith.mulf %55, %66 : vector<1x16xf32>
    %68 = arith.subf %13, %67 : vector<1x16xf32>
    %69 = vector.broadcast %66 : vector<1x16xf32> to vector<8x16xf32>
    %70 = arith.mulf %51, %69 : vector<8x16xf32>
    %71 = vector.broadcast %68 : vector<1x16xf32> to vector<8x16xf32>
    %72 = arith.addf %70, %71 : vector<8x16xf32>
    %cst_36 = arith.constant 0.000000e+00 : f32
    %73 = vector.broadcast %cst_36 : f32 to vector<8x16xf32>
    %74 = arith.maximumf %72, %73 : vector<8x16xf32>
    %cst_37 = arith.constant dense<0.000000e+00> : vector<8x16xf32>
    %75 = tpu.matmul %74, %4, %cst_37 {dimension_numbers = #tpu.dot_dimension_numbers<[1], [0], [0], [1], [0, 0, 1, 1], [], []>} : vector<8x16xf32>, vector<16x16xf32>, vector<8x16xf32> -> vector<8x16xf32>
    %76 = vector.broadcast %14 : vector<1x16xf32> to vector<8x16xf32>
    %77 = arith.addf %75, %76 : vector<8x16xf32>
    %78 = vector.extract_strided_slice %77 {offsets = [0, 0], sizes = [8, 8], strides = [1, 1]} : vector<8x16xf32> to vector<8x8xf32>
    %79 = vector.extract_strided_slice %77 {offsets = [0, 8], sizes = [8, 8], strides = [1, 1]} : vector<8x16xf32> to vector<8x8xf32>
    %cst_38 = arith.constant 5.000000e-01 : f32
    %80 = vector.broadcast %cst_38 : f32 to vector<8x8xf32>
    %81 = arith.mulf %79, %80 : vector<8x8xf32>
    %82 = math.exp %81 : vector<8x8xf32>
    %83 = arith.mulf %82, %1 : vector<8x8xf32>
    %84 = arith.addf %78, %83 : vector<8x8xf32>
    %cst_39 = arith.constant dense<0.000000e+00> : vector<8x8xf32>
    %85 = tpu.matmul %84, %5, %cst_39 {dimension_numbers = #tpu.dot_dimension_numbers<[1], [0], [0], [1], [0, 0, 1, 1], [], []>} : vector<8x8xf32>, vector<8x8xf32>, vector<8x8xf32> -> vector<8x8xf32>
    %86 = arith.addf %85, %48 : vector<8x8xf32>
    %cst_40 = arith.constant dense<0.000000e+00> : vector<8xf32>
    %87 = vector.multi_reduction <add>, %86, %cst_40 [0] : vector<8x8xf32> to vector<8xf32>
    %88 = vector.shape_cast %87 : vector<8xf32> to vector<1x8xf32>
    %cst_41 = arith.constant 8.000000e+00 : f32
    %89 = vector.broadcast %cst_41 : f32 to vector<1x8xf32>
    %90 = arith.divf %88, %89 : vector<1x8xf32>
    %91 = vector.broadcast %90 : vector<1x8xf32> to vector<8x8xf32>
    %92 = arith.subf %86, %91 : vector<8x8xf32>
    %93 = arith.mulf %92, %92 : vector<8x8xf32>
    %cst_42 = arith.constant dense<0.000000e+00> : vector<8xf32>
    %94 = vector.multi_reduction <add>, %93, %cst_42 [0] : vector<8x8xf32> to vector<8xf32>
    %95 = vector.shape_cast %94 : vector<8xf32> to vector<1x8xf32>
    %cst_43 = arith.constant 8.000000e+00 : f32
    %96 = vector.broadcast %cst_43 : f32 to vector<1x8xf32>
    %97 = arith.divf %95, %96 : vector<1x8xf32>
    %cst_44 = arith.constant 9.99999974E-6 : f32
    %98 = vector.broadcast %cst_44 : f32 to vector<1x8xf32>
    %99 = arith.addf %97, %98 : vector<1x8xf32>
    %100 = math.rsqrt %99 : vector<1x8xf32>
    %101 = arith.mulf %15, %100 : vector<1x8xf32>
    %102 = arith.mulf %90, %101 : vector<1x8xf32>
    %103 = arith.subf %16, %102 : vector<1x8xf32>
    %104 = vector.broadcast %101 : vector<1x8xf32> to vector<8x8xf32>
    %105 = arith.mulf %86, %104 : vector<8x8xf32>
    %106 = vector.broadcast %103 : vector<1x8xf32> to vector<8x8xf32>
    %107 = arith.addf %105, %106 : vector<8x8xf32>
    %cst_45 = arith.constant 0.000000e+00 : f32
    %108 = vector.broadcast %cst_45 : f32 to vector<8x8xf32>
    %109 = arith.maximumf %107, %108 : vector<8x8xf32>
    %cst_46 = arith.constant dense<0.000000e+00> : vector<8x32xf32>
    %110 = tpu.matmul %109, %6, %cst_46 {dimension_numbers = #tpu.dot_dimension_numbers<[1], [0], [0], [1], [0, 0, 1, 1], [], []>} : vector<8x8xf32>, vector<8x32xf32>, vector<8x32xf32> -> vector<8x32xf32>
    %111 = vector.broadcast %17 : vector<1x32xf32> to vector<8x32xf32>
    %112 = arith.addf %110, %111 : vector<8x32xf32>
    %cst_47 = arith.constant dense<0.000000e+00> : vector<32xf32>
    %113 = vector.multi_reduction <add>, %112, %cst_47 [0] : vector<8x32xf32> to vector<32xf32>
    %114 = vector.shape_cast %113 : vector<32xf32> to vector<1x32xf32>
    %cst_48 = arith.constant 8.000000e+00 : f32
    %115 = vector.broadcast %cst_48 : f32 to vector<1x32xf32>
    %116 = arith.divf %114, %115 : vector<1x32xf32>
    %117 = vector.broadcast %116 : vector<1x32xf32> to vector<8x32xf32>
    %118 = arith.subf %112, %117 : vector<8x32xf32>
    %119 = arith.mulf %118, %118 : vector<8x32xf32>
    %cst_49 = arith.constant dense<0.000000e+00> : vector<32xf32>
    %120 = vector.multi_reduction <add>, %119, %cst_49 [0] : vector<8x32xf32> to vector<32xf32>
    %121 = vector.shape_cast %120 : vector<32xf32> to vector<1x32xf32>
    %cst_50 = arith.constant 8.000000e+00 : f32
    %122 = vector.broadcast %cst_50 : f32 to vector<1x32xf32>
    %123 = arith.divf %121, %122 : vector<1x32xf32>
    %cst_51 = arith.constant 9.99999974E-6 : f32
    %124 = vector.broadcast %cst_51 : f32 to vector<1x32xf32>
    %125 = arith.addf %123, %124 : vector<1x32xf32>
    %126 = math.rsqrt %125 : vector<1x32xf32>
    %127 = arith.mulf %18, %126 : vector<1x32xf32>
    %128 = arith.mulf %116, %127 : vector<1x32xf32>
    %129 = arith.subf %19, %128 : vector<1x32xf32>
    %130 = vector.broadcast %127 : vector<1x32xf32> to vector<8x32xf32>
    %131 = arith.mulf %112, %130 : vector<8x32xf32>
    %132 = vector.broadcast %129 : vector<1x32xf32> to vector<8x32xf32>
    %133 = arith.addf %131, %132 : vector<8x32xf32>
    %cst_52 = arith.constant 0.000000e+00 : f32
    %134 = vector.broadcast %cst_52 : f32 to vector<8x32xf32>
    %135 = arith.maximumf %133, %134 : vector<8x32xf32>
    %cst_53 = arith.constant dense<0.000000e+00> : vector<8x16xf32>
    %136 = tpu.matmul %135, %7, %cst_53 {dimension_numbers = #tpu.dot_dimension_numbers<[1], [0], [0], [1], [0, 0, 1, 1], [], []>} : vector<8x32xf32>, vector<32x16xf32>, vector<8x16xf32> -> vector<8x16xf32>
    %137 = vector.broadcast %20 : vector<1x16xf32> to vector<8x16xf32>
    %138 = arith.addf %136, %137 : vector<8x16xf32>
    %139 = math.tanh %138 : vector<8x16xf32>
    %cst_54 = arith.constant 0.000000e+00 : f32
    %140 = vector.broadcast %cst_54 : f32 to vector<8x88xf32>
    %141 = tpu.concatenate %139, %84, %77, %140 in 1 : vector<8x16xf32>, vector<8x8xf32>, vector<8x16xf32>, vector<8x88xf32> -> vector<8x128xf32>
    %c0_55 = arith.constant 0 : index
    %c0_56 = arith.constant 0 : index
    %142 = vector.load %arg4[%c0_55, %c0_56] : memref<8x128xf32, #tpu.memory_space<vmem>>, vector<8x128xf32>
    tpu.vector_store %arg4[%c0_55, %c0_56], %141 {strides = array<i32>} : memref<8x128xf32, #tpu.memory_space<vmem>>, vector<8x128xf32>,
    return
  }
}

</mosaic_0001>

<bundles_post_ra>
// kernel: tpu_custom_call.1
= control target key start
LH: loop header
LB: loop body
LE: loop exit
PB: predicated region body
PF: predicated region fallthrough
CT: control target
= control target key end

     0   :  { %9 = vsyncpa [#allocation3], 0  ;;  %s1071_s0 = inlined_call_operand.hbm [shape: f32[8,20], index: 0, kind: input, shape index: {}]   ;;  %s1072_s1 = inlined_call_operand.hbm [shape: f32[8,8], index: 1, kind: input, shape index: {}]   ;;  %s1073_s2 = inlined_call_operand.hbm [shape: f32[120,128], index: 2, kind: input, shape index: {}]   ;;  %s1074_s3 = inlined_call_operand.hbm [shape: f32[16,128], index: 3, kind: input, shape index: {}]   ;;  %s1075_s4 = inlined_call_operand.hbm [shape: f32[8,128], index: 4, kind: output, shape index: {}]  }
   0x1   :  { %10 = vsyncpa [#allocation6], 0 }
   0x2   :  { %11 = vsyncpa [#allocation9], 0 }
   0x3   :  { %12 = vsyncpa [#allocation4], 0  ;;  %s964_s15 = smov [#allocation5]   ;;  %s965_s17 = smov [#allocation2]  }
   0x4   :  { %s29_s16 = sshll.u32 %s964_s15, 4  ;;  %s19_s18 = sshll.u32 %s965_s17, 4  ;;  %s30_s16 = int_to_ptr.vmem [resolvable:$true] %s29_s16  ;;  %s20_s18 = int_to_ptr.vmem [resolvable:$true] %s19_s18 }
   0x5   :  { %s864_s19 = scalar_lea.vmem %s30_s16, 128  ;;  %p869_p1 = scmp.lt.s32.totalorder %s30_s16, %s30_s16 }
   0x6   :  { %p865_p0 = scmp.ne.s32.totalorder %s30_s16, %s864_s19  ;;  %p870_p2 = scmp.lt.s32.totalorder %s864_s19, %s864_s19 }
   0x8   :  { %p871_p3 = por %p870_p2, %p869_p1 }
   0xa   :  { %p872_p4 = pnand %p871_p3, %p865_p0 }
   0xc   :  { %875 = shalt.err (!%p872_p4)
}
   0xd   :  { %32 = dma.hbm_to_vmem [thread:$0]  %s1072_s1, 128, %s30_s16, [#allocation6]  }
   0xe   :  { %s884_s22 = scalar_lea.vmem %s20_s18, 128  ;;  %p889_p6 = scmp.lt.s32.totalorder %s20_s18, %s20_s18 }
   0xf   :  { %p885_p5 = scmp.ne.s32.totalorder %s20_s18, %s884_s22  ;;  %p890_p7 = scmp.lt.s32.totalorder %s884_s22, %s884_s22 }
  0x11   :  { %p891_p8 = por %p890_p7, %p889_p6 }
  0x13   :  { %p892_p9 = pnand %p891_p8, %p885_p5 }
  0x15   :  { %895 = shalt.err (!%p892_p9)
}
  0x16   :  { %22 = dma.hbm_to_vmem [thread:$0]  %s1071_s0, 128, %s20_s18, [#allocation3]  }
  0x17   :  { %s966_s25 = smov [#allocation7]  }
  0x18   :  { %s38_s26 = sshll.u32 %s966_s25, 4  ;;  %s39_s26 = int_to_ptr.vmem [resolvable:$true] %s38_s26 }
  0x19   :  { %s904_s27 = scalar_lea.vmem %s39_s26, 1920  ;;  %p909_p11 = scmp.lt.s32.totalorder %s39_s26, %s39_s26 }
  0x1a   :  { %p905_p10 = scmp.ne.s32.totalorder %s39_s26, %s904_s27  ;;  %p910_p12 = scmp.lt.s32.totalorder %s904_s27, %s904_s27 }
  0x1c   :  { %p911_p13 = por %p910_p12, %p909_p11 }
  0x1e   :  { %p912_p0 = pnand %p911_p13, %p905_p10 }
  0x20   :  { %915 = shalt.err (!%p912_p0)
}
  0x21   :  { %s967_s1 = smov 128   ;;  %s968_s28 = smov 8  }
  0x22   :  { %44 = dma.hbm_to_vmem [thread:$0]  %s1073_s2, 1920, %s39_s26, [#allocation6], %s967_s1, %s967_s1, %s968_s28  }
  0x23   :  { %s969_s5 = smov [#allocation8]  }
  0x24   :  { %s50_s6 = sshll.u32 %s969_s5, 4  ;;  %s51_s6 = int_to_ptr.vmem [resolvable:$true] %s50_s6 }
  0x25   :  { %s924_s0 = scalar_lea.vmem %s51_s6, 256  ;;  %p929_p2 = scmp.lt.s32.totalorder %s51_s6, %s51_s6 }
  0x26   :  { %p925_p1 = scmp.ne.s32.totalorder %s51_s6, %s924_s0  ;;  %p930_p3 = scmp.lt.s32.totalorder %s924_s0, %s924_s0 }
  0x28   :  { %p931_p4 = por %p930_p3, %p929_p2 }
  0x2a   :  { %p932_p5 = pnand %p931_p4, %p925_p1 }
  0x2c   :  { %935 = shalt.err (!%p932_p5)
}
  0x2d   :  { %56 = dma.hbm_to_vmem [thread:$0]  %s1074_s3, 256, %s51_s6, [#allocation9], %s967_s1, %s967_s1, %s968_s28  }
  0x2e   :  { %956 = dma.done.wait [#allocation3], 128  }
  0x2f   :  { %957 = vsyncadd [#allocation3], 4294967168 }
  0x30   :  { %958 = dma.done.wait [#allocation6], 2048  }
  0x31   :  { %959 = vsyncadd [#allocation6], 4294965248 }
  0x32   :  { %960 = dma.done.wait [#allocation9], 256  }
  0x33   :  { %961 = vsyncadd [#allocation9], 4294967040  ;;  %v970_v0 = vmov 0.0   ;;  %vm971_vm0 = vmmov 0   ;;  %vm107_vm1 = vcmask 1043456   ;;  %v72_v2 = vld [vmem:[#allocation7 + $0x8] sm:$0xff]  ;;  %v206_v32 = vlaneseq }
  0x34   :  { %783 = vmatprep.subr.mxu0 %v970_v0  ;;  %789 = vmatprep.mubr.msk.f32.mxu0 %vm971_vm0, %v970_v0  ;;  %v73_v1 = vld [vmem:[#allocation7 + $0x10] sm:$0xf]  ;;  %v71_v3 = vld [vmem:[#allocation7] sm:$0xff]  ;;  %vm103_vm2 = vcmask 162816   ;;  %v76_v6 = vld [vmem:[#allocation7 + $0x28] sm:$0xff]  ;;  %vm181_vm3 = vcmask 261120  }
  0x35   :  { %792 = vmatprep.subr.mxu1 %v970_v0  ;;  %800 = vmatprep.mubr.msk.f32.mxu1 %vm971_vm0, %v970_v0  ;;  %v69_v4 = vld [vmem:[#allocation2] sm:$0xff]  ;;  %v75_v7 = vld [vmem:[#allocation7 + $0x20] sm:$0xff]  ;;  %v74_v8 = vld [vmem:[#allocation7 + $0x18] sm:$0xff]  ;;  %s972_s2 = smov 96   ;;  %v207_v33 = vshrl.u32 %v206_v32, 7  ;;  %vm294_vm4 = vcmask 130048  }
  0x36   :  { %784 = vmatpush3.msk.msra.mxu0 %vm107_vm1, %v73_v1  ;;  %v77_v5 = vld [vmem:[#allocation7 + $0x30] sm:$0xff]  ;;  %v750_v9 = vld [vmem:[#allocation8] ss:$0 sm:$0xff]  ;;  %v87_v34 = vld [vmem:[#allocation8 + $0x1] sm:$0x1]  ;;  %s973_s3 = smov 120  }
  0x37   :  { %785 = vmatprep.subr.mxu0 %v970_v0  ;;  %793 = vmatpush3.msra.mxu1 %v77_v5  ;;  %v1033_v35 = vsub.s32 0, %v207_v33  ;;  %v88_v38 = vld [vmem:[#allocation8 + $0x2] sm:$0x1]  ;;  %v79_v46 = vld [vmem:[#allocation7 + $0x40] sm:$0xff]  ;;  %v753_v49 = vld [vmem:[#allocation8 + $0x3] ss:$0 sm:$0xff] }
  0x38   :  { %786 = vmatpush3.msra.mxu0 %v72_v2  ;;  %794 = vmatprep.subr.mxu1 %v970_v0  ;;  %v78_v47 = vld [vmem:[#allocation7 + $0x38] sm:$0xff]  ;;  %s974_s9 = smov 24   ;;  %vm423_vm5 = vcmask 64512   ;;  %s975_s10 = smov 16   ;;  %v81_v32 = vld [vmem:[#allocation7 + $0x50] sm:$0xff]  ;;  %vm728_vm6 = vcmask 195584  }
  0x39   :  { %787 = vmatprep.subr.mxu0 %v970_v0  ;;  %795 = vmatpush3.msra.mxu1 %v76_v6  ;;  %v70_v48 = vld [vmem:[#allocation5] sm:$0xff]  ;;  %s976_s11 = smov [#allocation10]   ;;  %vm730_vm7 = vcmask 326656  }
  0x3a   :  { %788 = vmatpush3.msra.mxu0 %v71_v3  ;;  %796 = vmatprep.subr.mxu1 %v970_v0  ;;  %s739_s12 = sshll.u32 %s976_s11, 4  ;;  %s740_s12 = int_to_ptr.vmem [resolvable:$true] %s739_s12 }
  0x3b   :  { %790 = vmatmul.mubr.msk.f32.vlgmr.msra.gmra.mxu0 %vm103_vm2, %v69_v4  ;;  %803 = vmatprep.subr.mxu0 %v970_v0  ;;  %s936_s13 = scalar_lea.vmem %s740_s12, 128  ;;  %p941_p7 = scmp.lt.s32.totalorder %s740_s12, %s740_s12 }
  0x3c   :  { %807 = vmatprep.mubr.msk.f32.mxu0 %vm971_vm0, %v970_v0  ;;  %797 = vmatpush3.msra.mxu1 %v75_v7  ;;  %p937_p6 = scmp.ne.s32.totalorder %s740_s12, %s936_s13  ;;  %p942_p8 = scmp.lt.s32.totalorder %s936_s13, %s936_s13 }
  0x3d   :  { %798 = vmatprep.subr.mxu1 %v970_v0  ;;  %804 = vmatpush3.msra.mxu0 %v79_v46 }
  0x3e   :  { %799 = vmatpush3.msra.mxu1 %v74_v8  ;;  %805 = vmatprep.subr.mxu0 %v970_v0  ;;  %p943_p9 = por %p942_p8, %p941_p7 }
  0x3f   :  { %820 = vmatprep.subr.mxu1 %v970_v0  ;;  %806 = vmatpush3.msra.mxu0 %v78_v47 }
  0x40   :  { %810 = vmatprep.subr.mxu0 %v970_v0  ;;  %410 = vrot.lane.b32.xlu0 %v70_v48, %s968_s28  ;;  %p944_p10 = pnand %p943_p9, %p937_p6 }
  0xfb   :  { %v177_v10 = vpop.f32.mrf.mxu0 }
  0xfc   :  { %v178_v11 = vadd.f32 %v750_v9, %v177_v10  ;;  %v90_v9 = vld [vmem:[#allocation8 + $0x4] sm:$0x1] }
  0xfd   :  { %v791_v12 = vpop.f32.mrf.mxu0 }
  0xfe   :  { %v182_v13 = vsel %vm181_vm3, %v178_v11, 0.0  ;;  %420 = vrot.lane.b32.xlu1 %v178_v11, %s972_s2  ;;  %v91_v12 = vld [vmem:[#allocation8 + $0x5] sm:$0x1] }
  0xff   :  { %v183_v14 = vrot.slane %v182_v13, 4 }
 0x101   :  { %v184_v15 = vadd.f32 %v183_v14, %v182_v13 }
 0x103   :  { %v185_v16 = vrot.slane %v184_v15, 2 }
 0x105   :  { %v186_v17 = vadd.f32 %v185_v16, %v184_v15 }
 0x107   :  { %v187_v18 = vrot.slane %v186_v17, 1 }
 0x109   :  { %v188_v19 = vadd.f32 %v187_v18, %v186_v17 }
 0x10b   :  { %v190_v20 = vmul.f32 0.125, %v188_v19 }
 0x10d   :  { %v191_v21 = vsub.f32 %v178_v11, %v190_v20 }
 0x10f   :  { %v192_v22 = vmul.f32 %v191_v21, %v191_v21  ;;  %v755_v21 = vld [vmem:[#allocation8 + $0x6] ss:$0 sm:$0xff] }
 0x111   :  { %v193_v23 = vsel %vm181_vm3, %v192_v22, 0.0 }
 0x112   :  { %v194_v24 = vrot.slane %v193_v23, 4 }
 0x114   :  { %v195_v25 = vadd.f32 %v194_v24, %v193_v23 }
 0x116   :  { %v196_v26 = vrot.slane %v195_v25, 2 }
 0x118   :  { %v197_v27 = vadd.f32 %v196_v26, %v195_v25 }
 0x11a   :  { %v198_v28 = vrot.slane %v197_v27, 1 }
 0x11c   :  { %v199_v29 = vadd.f32 %v198_v28, %v197_v27  ;;  %v411_v27 = vpop.permute.xlu0 %410 }
 0x11e   :  { %v200_v30 = vmul.f32 0.125, %v199_v29 }
 0x120   :  { %v201_v31 = vadd.f32 1e-05, %v200_v30 }
 0x122   :  { %844 = vrsqrt.f32 %v201_v31 }
 0x12f   :  { %v845_v36 = vpop.eup %844 }
 0x130   :  { %v203_v37 = vmul.f32 %v845_v36, %v87_v34 }
 0x132   :  { %v204_v39 = vmul.f32 %v203_v37, %v190_v20  ;;  %v209_v40 = vrot.slane %v203_v37, %v1033_v35  ;;  %v80_v20 = vld [vmem:[#allocation7 + $0x48] sm:$0xff] }
 0x134   :  { %v205_v41 = vsub.f32 %v88_v38, %v204_v39  ;;  %v210_v42 = vmul.f32 %v209_v40, %v178_v11 }
 0x136   :  { %v214_v43 = vrot.slane %v205_v41, %v1033_v35 }
 0x138   :  { %v215_v44 = vadd.f32 %v214_v43, %v210_v42 }
 0x13a   :  { %v216_v45 = vmax.f32 %v215_v44, 0.0 }
 0x13c   :  { %801 = vmatmul.mubr.msk.f32.vlgmr.msra.gmra.mxu1 %vm181_vm3, %v216_v45 }
 0x13d   :  { %828 = vmatprep.mubr.msk.f32.mxu1 %vm971_vm0, %v970_v0 }
 0x170   :  { %v421_v33 = vpop.permute.xlu1 %420 }
 0x1fc   :  { %v290_v50 = vpop.f32.mrf.mxu1 }
 0x1fd   :  { %v291_v51 = vadd.f32 %v753_v49, %v290_v50 }
 0x1fe   :  { %v802_v52 = vpop.f32.mrf.mxu1 }
 0x1ff   :  { %v295_v53 = vsel %vm294_vm4, %v291_v51, 0.0 }
 0x200   :  { %v296_v54 = vrot.slane %v295_v53, 4 }
 0x202   :  { %v297_v55 = vadd.f32 %v296_v54, %v295_v53 }
 0x204   :  { %v298_v56 = vrot.slane %v297_v55, 2 }
 0x206   :  { %v299_v57 = vadd.f32 %v298_v56, %v297_v55 }
 0x208   :  { %v300_v58 = vrot.slane %v299_v57, 1 }
 0x20a   :  { %v301_v59 = vadd.f32 %v300_v58, %v299_v57  ;;  %v93_v57 = vld [vmem:[#allocation8 + $0x7] sm:$0x1] }
 0x20c   :  { %v302_v60 = vmul.f32 0.125, %v301_v59 }
 0x20e   :  { %v303_v61 = vsub.f32 %v291_v51, %v302_v60 }
 0x210   :  { %v304_v62 = vmul.f32 %v303_v61, %v303_v61 }
 0x212   :  { %v305_v63 = vsel %vm294_vm4, %v304_v62, 0.0 }
 0x213   :  { %v306_v1 = vrot.slane %v305_v63, 4 }
 0x215   :  { %v307_v2 = vadd.f32 %v306_v1, %v305_v63 }
 0x217   :  { %v308_v3 = vrot.slane %v307_v2, 2 }
 0x219   :  { %v309_v4 = vadd.f32 %v308_v3, %v307_v2 }
 0x21b   :  { %v310_v5 = vrot.slane %v309_v4, 1 }
 0x21d   :  { %v311_v6 = vadd.f32 %v310_v5, %v309_v4  ;;  %v85_v5 = vld [vmem:[#allocation7 + $0x70] sm:$0xff] }
 0x21e   :  { %821 = vmatpush3.msra.mxu1 %v85_v5 }
 0x21f   :  { %v312_v7 = vmul.f32 0.125, %v311_v6  ;;  %822 = vmatprep.subr.mxu1 %v970_v0  ;;  %v84_v6 = vld [vmem:[#allocation7 + $0x68] sm:$0xff] }
 0x220   :  { %823 = vmatpush3.msra.mxu1 %v84_v6 }
 0x221   :  { %v313_v8 = vadd.f32 1e-05, %v312_v7  ;;  %824 = vmatprep.subr.mxu1 %v970_v0  ;;  %v83_v7 = vld [vmem:[#allocation7 + $0x60] sm:$0xff] }
 0x222   :  { %825 = vmatpush3.msra.mxu1 %v83_v7 }
 0x223   :  { %846 = vrsqrt.f32 %v313_v8  ;;  %826 = vmatprep.subr.mxu1 %v970_v0  ;;  %v82_v8 = vld [vmem:[#allocation7 + $0x58] sm:$0xff] }
 0x224   :  { %827 = vmatpush3.msra.mxu1 %v82_v8 }
 0x230   :  { %v847_v10 = vpop.eup %846 }
 0x231   :  { %v315_v11 = vmul.f32 %v847_v10, %v90_v9  ;;  %v758_v9 = vld [vmem:[#allocation8 + $0x9] ss:$0 sm:$0xff] }
 0x233   :  { %v316_v13 = vmul.f32 %v315_v11, %v302_v60  ;;  %v321_v14 = vrot.slane %v315_v11, %v1033_v35  ;;  %v94_v60 = vld [vmem:[#allocation8 + $0x8] sm:$0x1] }
 0x235   :  { %v317_v15 = vsub.f32 %v91_v12, %v316_v13  ;;  %v322_v16 = vmul.f32 %v321_v14, %v291_v51 }
 0x237   :  { %v326_v17 = vrot.slane %v317_v15, %v1033_v35 }
 0x239   :  { %v327_v18 = vadd.f32 %v326_v17, %v322_v16 }
 0x23b   :  { %v328_v19 = vmax.f32 %v327_v18, 0.0 }
 0x23d   :  { %808 = vmatmul.mubr.msk.f32.vlgmr.msra.gmra.mxu0 %vm294_vm4, %v328_v19 }
 0x23e   :  { %812 = vmatprep.mubr.msk.f32.mxu0 %vm971_vm0, %v970_v0  ;;  %811 = vmatpush3.msra.mxu0 %v80_v20 }
 0x23f   :  { %815 = vmatprep.subr.mxu0 %v970_v0 }
 0x2fd   :  { %v402_v22 = vpop.f32.mrf.mxu0 }
 0x2fe   :  { %v403_v23 = vadd.f32 %v755_v21, %v402_v22 }
 0x2ff   :  { %v809_v24 = vpop.f32.mrf.mxu0 }
 0x300   :  { %v406_v25 = vmul.f32 0.5, %v403_v23 }
 0x302   :  { %v407_v26 = vmul.f32 1.442695, %v406_v25 }
 0x304   :  { %848 = vpow2.f32 %v407_v26 }
 0x311   :  { %v849_v28 = vpop.eup %848 }
 0x312   :  { %v413_v29 = vmul.f32 %v849_v28, %v411_v27 }
 0x314   :  { %415 = vrot.lane.b32.xlu0 %v413_v29, %s973_s3 }
 0x318   :  { %724 = vrot.lane.b32.xlu0 %v403_v23, %s974_s9 }
 0x386   :  { %v416_v30 = vpop.permute.xlu0 %415 }
 0x387   :  { %v418_v31 = vadd.f32 %v416_v30, %v403_v23 }
 0x389   :  { %720 = vrot.lane.b32.xlu1 %v418_v31, %s975_s10  ;;  %813 = vmatmul.mubr.msk.f32.vlgmr.msra.gmra.mxu0 %vm423_vm5, %v418_v31  ;;  %v96_v31 = vld [vmem:[#allocation8 + $0xa] sm:$0x1] }
 0x38a   :  { %817 = vmatprep.mubr.msk.f32.mxu0 %vm971_vm0, %v970_v0  ;;  %816 = vmatpush3.msra.mxu0 %v81_v32 }
 0x449   :  { %v493_v34 = vpop.f32.mrf.mxu0 }
 0x44a   :  { %v494_v36 = vadd.f32 %v493_v34, %v421_v33  ;;  %v97_v34 = vld [vmem:[#allocation8 + $0xb] sm:$0x1] }
 0x44b   :  { %v814_v37 = vpop.f32.mrf.mxu0 }
 0x44c   :  { %v497_v38 = vsel %vm423_vm5, %v494_v36, 0.0 }
 0x44d   :  { %v498_v39 = vrot.slane %v497_v38, 4 }
 0x44f   :  { %v499_v40 = vadd.f32 %v498_v39, %v497_v38 }
 0x451   :  { %v500_v41 = vrot.slane %v499_v40, 2 }
 0x453   :  { %v501_v42 = vadd.f32 %v500_v41, %v499_v40 }
 0x455   :  { %v502_v43 = vrot.slane %v501_v42, 1 }
 0x457   :  { %v503_v44 = vadd.f32 %v502_v43, %v501_v42  ;;  %v760_v43 = vld [vmem:[#allocation8 + $0xc] ss:$0 sm:$0xff] }
 0x459   :  { %v504_v45 = vmul.f32 0.125, %v503_v44 }
 0x45b   :  { %v505_v46 = vsub.f32 %v494_v36, %v504_v45 }
 0x45d   :  { %v506_v47 = vmul.f32 %v505_v46, %v505_v46 }
 0x45f   :  { %v507_v48 = vsel %vm423_vm5, %v506_v47, 0.0 }
 0x460   :  { %v508_v49 = vrot.slane %v507_v48, 4 }
 0x462   :  { %v509_v50 = vadd.f32 %v508_v49, %v507_v48  ;;  %v721_v48 = vpop.permute.xlu1 %720  ;;  %v725_v49 = vpop.permute.xlu0 %724 }
 0x464   :  { %v510_v51 = vrot.slane %v509_v50, 2 }
 0x466   :  { %v511_v52 = vadd.f32 %v510_v51, %v509_v50 }
 0x468   :  { %v512_v53 = vrot.slane %v511_v52, 1 }
 0x46a   :  { %v513_v54 = vadd.f32 %v512_v53, %v511_v52 }
 0x46c   :  { %v514_v55 = vmul.f32 0.125, %v513_v54 }
 0x46e   :  { %v515_v56 = vadd.f32 1e-05, %v514_v55 }
 0x470   :  { %850 = vrsqrt.f32 %v515_v56 }
 0x47d   :  { %v851_v58 = vpop.eup %850 }
 0x47e   :  { %v517_v59 = vmul.f32 %v851_v58, %v93_v57 }
 0x480   :  { %v518_v61 = vmul.f32 %v517_v59, %v504_v45  ;;  %v523_v62 = vrot.slane %v517_v59, %v1033_v35 }
 0x482   :  { %v519_v63 = vsub.f32 %v94_v60, %v518_v61  ;;  %v524_v1 = vmul.f32 %v523_v62, %v494_v36 }
 0x484   :  { %v528_v2 = vrot.slane %v519_v63, %v1033_v35 }
 0x486   :  { %v529_v3 = vadd.f32 %v528_v2, %v524_v1 }
 0x488   :  { %v530_v4 = vmax.f32 %v529_v3, 0.0 }
 0x48a   :  { %818 = vmatmul.mubr.msk.f32.vlgmr.msra.gmra.mxu0 %vm423_vm5, %v530_v4 }
 0x54a   :  { %v604_v10 = vpop.f32.mrf.mxu0 }
 0x54b   :  { %v605_v11 = vadd.f32 %v758_v9, %v604_v10 }
 0x54c   :  { %v819_v12 = vpop.f32.mrf.mxu0 }
 0x54d   :  { %v608_v13 = vsel %vm181_vm3, %v605_v11, 0.0 }
 0x54e   :  { %v609_v14 = vrot.slane %v608_v13, 4 }
 0x550   :  { %v610_v15 = vadd.f32 %v609_v14, %v608_v13 }
 0x552   :  { %v611_v16 = vrot.slane %v610_v15, 2 }
 0x554   :  { %v612_v17 = vadd.f32 %v611_v16, %v610_v15 }
 0x556   :  { %v613_v18 = vrot.slane %v612_v17, 1 }
 0x558   :  { %v614_v19 = vadd.f32 %v613_v18, %v612_v17 }
 0x55a   :  { %v615_v20 = vmul.f32 0.125, %v614_v19 }
 0x55c   :  { %v616_v21 = vsub.f32 %v605_v11, %v615_v20 }
 0x55e   :  { %v617_v22 = vmul.f32 %v616_v21, %v616_v21 }
 0x560   :  { %v618_v23 = vsel %vm181_vm3, %v617_v22, 0.0 }
 0x561   :  { %v619_v0 = vrot.slane %v618_v23, 4 }
 0x563   :  { %v620_v24 = vadd.f32 %v619_v0, %v618_v23 }
 0x565   :  { %v621_v25 = vrot.slane %v620_v24, 2 }
 0x567   :  { %v622_v26 = vadd.f32 %v621_v25, %v620_v24 }
 0x569   :  { %v623_v27 = vrot.slane %v622_v26, 1 }
 0x56b   :  { %v624_v28 = vadd.f32 %v623_v27, %v622_v26 }
 0x56d   :  { %v625_v29 = vmul.f32 0.125, %v624_v28 }
 0x56f   :  { %v626_v30 = vadd.f32 1e-05, %v625_v29 }
 0x571   :  { %852 = vrsqrt.f32 %v626_v30 }
 0x57e   :  { %v853_v32 = vpop.eup %852 }
 0x57f   :  { %v628_v33 = vmul.f32 %v853_v32, %v96_v31 }
 0x581   :  { %v629_v36 = vmul.f32 %v628_v33, %v615_v20  ;;  %v634_v37 = vrot.slane %v628_v33, %v1033_v35 }
 0x583   :  { %v630_v38 = vsub.f32 %v97_v34, %v629_v36  ;;  %v635_v39 = vmul.f32 %v634_v37, %v605_v11 }
 0x585   :  { %v639_v40 = vrot.slane %v630_v38, %v1033_v35 }
 0x587   :  { %v640_v41 = vadd.f32 %v639_v40, %v635_v39 }
 0x589   :  { %v641_v42 = vmax.f32 %v640_v41, 0.0 }
 0x58b   :  { %829 = vmatmul.mubr.msk.f32.vlgmr.msra.gmra.mxu1 %vm181_vm3, %v641_v42 }
 0x64b   :  { %v715_v44 = vpop.f32.mrf.mxu1 }
 0x64c   :  { %v716_v45 = vadd.f32 %v760_v43, %v715_v44 }
 0x64d   :  { %v830_v46 = vpop.f32.mrf.mxu1 }
 0x64e   :  { %854 = vtanh.f32 %v716_v45 }
 0x65b   :  { %v855_v47 = vpop.eup %854 }
 0x65c   :  { %v727_v50 = vsel %vm294_vm4, %v855_v47, %v721_v48 }
 0x65d   :  { %v729_v51 = vsel %vm728_vm6, %v727_v50, %v725_v49 }
 0x65e   :  { %v731_v35 = vsel %vm730_vm7, %v729_v51, 0.0 }
 0x65f   :  { %732 = vst [vmem:[#allocation10] sm:$0xff] %v731_v35 }
 0x660   :  { %947 = shalt.err (!%p944_p10)
}
 0x661   :  { %742 = dma.vmem_to_hbm [thread:$0]  %s740_s12, 128, %s1075_s4, [#allocation4]  }
 0x662   :  { %962 = dma.done.wait [#allocation4], 128  }
 0x663   :  { %963 = vsyncadd [#allocation4], 4294967168 }
 0x664   :  { %746 = vsyncpa [#allocation3], 1 }
 0x665   :  { %747 = vsyncpa [#allocation6], 1 }
 0x666   :  { %748 = vsyncpa [#allocation9], 1 }
 0x667   :  { %749 = vsyncpa [#allocation4], 1 }

</bundles_post_ra>
